<compile_context>
chip_gen: v5e
topology: v5e:2x2
jax: 0.10.0
libtpu: 0.0.40
codegen_flags: <defaults>
</compile_context>

<pallas_src>
import functools

import jax
import jax.numpy as jnp
from jax.experimental import pallas as pl
from jax.experimental.pallas import tpu as pltpu

EPS = 1e-5


def _vmem_limit_bytes():
    # Per-generation VMEM budget (~75% of physical): ~96 MiB on v5e/v6e
    # (128 MiB parts), ~48 MiB on v7x (64 MiB per TC).  Conservative fallback.
    try:
        cap = int(pltpu.get_tpu_info().vmem_capacity_bytes)
    except Exception:
        cap = 64 * 1024 * 1024
    return cap * 3 // 4


def _pick_nb(N, H, target_m=256):
    """Images per grid step: fill the MXU M-dimension (~256 rows) while
    keeping the grid >= 2 steps so v7x's two TensorCores both get work."""
    divisors = [d for d in range(1, N + 1) if N % d == 0]
    cands = [d for d in divisors if d * (H + 2) <= target_m] or [1]
    pref = [d for d in cands if N // d >= 2]
    return max(pref) if pref else max(cands)


def _invariant_weight_spec(block_shape):
    # Grid-invariant block -> single-buffer it (saves VMEM, esp. on v7x's
    # 64 MiB).  Fall back gracefully if pipeline_mode isn't accepted.
    idx = lambda n: (0, 0, 0)
    try:
        return pl.BlockSpec(block_shape, idx, pipeline_mode=pl.Buffered(1))
    except TypeError:
        return pl.BlockSpec(block_shape, idx)


# --------------------------------------------------------------------------
# Conv kernel: 3x3 SAME conv over an Nb-image block (optionally preceded by a
# folded BN+ReLU on the input), producing bf16 pre-BN output + f32 BN partials.
# --------------------------------------------------------------------------
def _conv3x3_kernel(*refs, H, W, cin, cout, Nb, apply_bn_relu):
    # Refs (in order):
    #   [scale_ref, shift_ref]  (1, W*cin) f32     only when apply_bn_relu
    #   x_ref      (Nb, H, W*cin)      f32 (conv1) / bf16 (conv2 input = y1)
    #   w_ref      (3, W*cin, W*cout)  bf16 shifted block-Toeplitz weights
    #   y_ref      (Nb, H, W*cout)     bf16 pre-BN conv output (lane-dense)
    #   stats_ref  (1, 2, W*cout)      f32 per-block [sum, sumsq] partials
    #   pbuf       VMEM (Nb, H+2, W*cin) bf16  vertically padded activations
    if apply_bn_relu:
        scale_ref, shift_ref, x_ref, w_ref, y_ref, stats_ref, pbuf = refs
        x = x_ref[...].astype(jnp.float32)                 # (Nb, H, W*cin)
        sc = scale_ref[...].reshape(1, 1, W * cin)
        sh = shift_ref[...].reshape(1, 1, W * cin)
        xb = jnp.maximum(x * sc + sh, 0.0).astype(jnp.bfloat16)
    else:
        x_ref, w_ref, y_ref, stats_ref, pbuf = refs
        xb = x_ref[...].astype(jnp.bfloat16)

    # Vertical zero halo + interior: all full-width, lane-aligned bf16 stores.
    # (Horizontal padding is handled inside the Toeplitz band, so no halo
    # columns and no masked stores.)
    zrow = jnp.zeros((Nb, 1, W * cin), jnp.bfloat16)
    pbuf[:, 0:1, :] = zrow
    pbuf[:, H + 1:H + 2, :] = zrow
    pbuf[:, 1:H + 1, :] = xb

    # 3 MXU pushes (one per kernel row dy) on the whole Nb-image block.
    # K = W*cin, N = W*cout, M = Nb*(H+2)-2 (the 2 rows straddling image
    # boundaries are computed and discarded).  bf16 operands, f32 accumulate.
    M = Nb * (H + 2) - 2
    pb = pbuf[...].reshape(Nb * (H + 2), W * cin)
    acc = jnp.zeros((M, W * cout), jnp.float32)
    for dy in range(3):
        acc += jnp.dot(pb[dy:dy + M, :], w_ref[dy],
                       preferred_element_type=jnp.float32)

    # Per-image extraction of the H valid rows, bf16 store, and single-pass
    # f32 BN partial stats (per-lane sum / sum-of-squares; lane = w*cout + c).
    ssum = jnp.zeros((1, W * cout), jnp.float32)
    ssq = jnp.zeros((1, W * cout), jnp.float32)
    for b in range(Nb):
        blk = acc[b * (H + 2):b * (H + 2) + H, :]          # (H, W*cout) f32
        y_ref[b] = blk.astype(jnp.bfloat16)
        ssum += jnp.sum(blk, axis=0, keepdims=True)
        ssq += jnp.sum(blk * blk, axis=0, keepdims=True)
    stats_ref[0, 0:1, :] = ssum
    stats_ref[0, 1:2, :] = ssq


# --------------------------------------------------------------------------
# Wrappers
# --------------------------------------------------------------------------
def _toeplitz_weights(w_hwio, W):
    """Fold the 3 dx taps of a 3x3 SAME conv into shifted block-banded weights.

    Returns (3, W*Cin, W*Cout) bf16.  Out-of-range horizontal taps are simply
    left out of the band (zero contribution), so the activation rows need no
    horizontal halo and land at lane offset 0.
    """
    kh, kw, ci, co = w_hwio.shape
    mats = []
    for dy in range(kh):
        t = jnp.zeros((W * ci, W * co), jnp.float32)
        for dx in range(kw):
            # ones at (j, w) with j = w + dx - 1, clipped to [0, W)
            e = jnp.eye(W, W, k=1 - dx, dtype=jnp.float32)
            t = t + jnp.kron(e, w_hwio[dy, dx].astype(jnp.float32))
        mats.append(t)
    return jnp.stack(mats).astype(jnp.bfloat16)


def _conv_call(x, toep_w, scale, shift, *, H, W, cin, cout, Nb, apply_bn_relu):
    N = x.shape[0]
    G = N // Nb
    kernel = functools.partial(_conv3x3_kernel, H=H, W=W, cin=cin, cout=cout,
                               Nb=Nb, apply_bn_relu=apply_bn_relu)
    in_specs = [
        pl.BlockSpec((Nb, H, W * cin), lambda n: (n, 0, 0)),        # x block
        _invariant_weight_spec((3, W * cin, W * cout)),             # weights
    ]
    args = [x, toep_w]
    if apply_bn_relu:
        in_specs = [pl.BlockSpec((1, W * cin), lambda n: (0, 0)),   # scale
                    pl.BlockSpec((1, W * cin), lambda n: (0, 0)),   # shift
                    ] + in_specs
        args = [scale, shift] + args
    return pl.pallas_call(
        kernel,
        grid=(G,),
        in_specs=in_specs,
        out_specs=(
            pl.BlockSpec((Nb, H, W * cout), lambda n: (n, 0, 0)),   # y (lane-dense)
            pl.BlockSpec((1, 2, W * cout), lambda n: (n, 0, 0)),    # stats partials
        ),
        out_shape=(
            jax.ShapeDtypeStruct((N, H, W * cout), jnp.bfloat16),
            jax.ShapeDtypeStruct((G, 2, W * cout), jnp.float32),
        ),
        scratch_shapes=[pltpu.VMEM((Nb, H + 2, W * cin), jnp.bfloat16)],
        compiler_params=pltpu.CompilerParams(
            dimension_semantics=("parallel",),
            vmem_limit_bytes=_vmem_limit_bytes()),
    )(*args)


def _fold_bn(stats_partial, gamma, beta, *, count, W, cout):
    """Tiny O(C) glue: partial sums -> training-mode BN scale/shift per lane."""
    tot = jnp.sum(stats_partial, axis=0)            # (2, W*cout)
    tot = tot.reshape(2, W, cout).sum(axis=1)       # (2, cout)
    mean = tot[0] / count
    # NOTE: E[x^2]-mean^2 in f32; fine near zero-mean activations at this scale.
    var = tot[1] / count - mean * mean
    scale_c = gamma * jax.lax.rsqrt(var + EPS)
    shift_c = beta - mean * scale_c
    scale = jnp.tile(scale_c, W).reshape(1, W * cout)   # lane = w*cout + c
    shift = jnp.tile(shift_c, W).reshape(1, W * cout)
    return scale, shift


def double_conv(x_nchw, w1_hwio, g1, b1, w2_hwio, g2, b2):
    """x_nchw: (N, Cin, H, W) f32.  Conv weights in HWIO (3,3,Ci,Co), no bias."""
    N, Cin, H, W = x_nchw.shape
    Cout = w1_hwio.shape[-1]
    count = N * H * W
    Nb = _pick_nb(N, H)

    # NCHW -> lane-dense (N, H, W*Cin) (glue).
    x = jnp.transpose(x_nchw, (0, 2, 3, 1)).astype(jnp.float32).reshape(N, H, W * Cin)

    t1 = _toeplitz_weights(w1_hwio, W)              # (3, W*Cin,  W*Cout) bf16
    t2 = _toeplitz_weights(w2_hwio, W)              # (3, W*Cout, W*Cout) bf16

    # conv1 (no preceding BN/ReLU) -> bf16 y1 + f32 BN1 partial stats
    y1, s1 = _conv_call(x, t1, None, None, H=H, W=W, cin=Cin, cout=Cout,
                        Nb=Nb, apply_bn_relu=False)

    # BN1 fold (O(C) glue) + ReLU fused into conv2's input read
    sc1, sh1 = _fold_bn(s1, g1.astype(jnp.float32), b1.astype(jnp.float32),
                        count=count, W=W, cout=Cout)
    y2, s2 = _conv_call(y1, t2, sc1, sh1, H=H, W=W, cin=Cout, cout=Cout,
                        Nb=Nb, apply_bn_relu=True)

    # BN2 + ReLU fused into the plain-JAX output reshape/transpose glue
    # (XLA fuses the elementwise with the transpose; no third kernel pass).
    sc2, sh2 = _fold_bn(s2, g2.astype(jnp.float32), b2.astype(jnp.float32),
                        count=count, W=W, cout=Cout)
    y3 = jnp.maximum(y2.astype(jnp.float32) * sc2 + sh2, 0.0)   # (N, H, W*Cout)
    return jnp.transpose(y3.reshape(N, H, W, Cout), (0, 3, 1, 2))


# --------------------------------------------------------------------------
# Pure-JAX reference (training-mode BatchNorm, biased variance)
# --------------------------------------------------------------------------
def _reference(x_nchw, w1_hwio, g1, b1, w2_hwio, g2, b2):
    x = jnp.transpose(x_nchw, (0, 2, 3, 1))

    def conv(h, w):
        return jax.lax.conv_general_dilated(
            h, w, (1, 1), "SAME", dimension_numbers=("NHWC", "HWIO", "NHWC"))

    def bn_relu(h, g, b):
        m = jnp.mean(h, axis=(0, 1, 2), keepdims=True)
        v = jnp.mean((h - m) ** 2, axis=(0, 1, 2), keepdims=True)
        return jnp.maximum((h - m) * jax.lax.rsqrt(v + EPS) * g + b, 0.0)

    h = bn_relu(conv(x, w1_hwio), g1, b1)
    y = bn_relu(conv(h, w2_hwio), g2, b2)
    return jnp.transpose(y, (0, 3, 1, 2))


if __name__ == "__main__":
    N, Cin, Cout, H, W = 2, 4, 8, 16, 16

    key = jax.random.PRNGKey(0)
    kx, kw1, kw2, kg1, kb1, kg2, kb2 = jax.random.split(key, 7)

    x = jax.random.normal(kx, (N, Cin, H, W), dtype=jnp.float32)
    # Conv weights in HWIO layout (equivalent to PyTorch OIHW transposed).
    w1 = 0.1 * jax.random.normal(kw1, (3, 3, Cin, Cout), dtype=jnp.float32)
    w2 = 0.1 * jax.random.normal(kw2, (3, 3, Cout, Cout), dtype=jnp.float32)
    g1 = 1.0 + 0.1 * jax.random.normal(kg1, (Cout,), dtype=jnp.float32)
    b1 = 0.1 * jax.random.normal(kb1, (Cout,), dtype=jnp.float32)
    g2 = 1.0 + 0.1 * jax.random.normal(kg2, (Cout,), dtype=jnp.float32)
    b2 = 0.1 * jax.random.normal(kb2, (Cout,), dtype=jnp.float32)

    y = jax.jit(double_conv)(x, w1, g1, b1, w2, g2, b2)
    y = jax.block_until_ready(y)

    y_ref = _reference(x, w1, g1, b1, w2, g2, b2)
    assert y.shape == (N, Cout, H, W)
    # tolerance accommodates bf16 MXU operands / bf16 intermediates
    assert jnp.allclose(y, y_ref, atol=5e-2, rtol=5e-2), "mismatch vs reference"

    print("KERNEL_OK")
</pallas_src>

<mosaic_0001>
module attributes {stable_mosaic.version = 11 : i64} {
  func.func @_conv3x3_kernel(%arg0: i32, %arg1: memref<1x16x64xf32, #tpu.memory_space<vmem>>, %arg2: memref<3x64x128xbf16, #tpu.memory_space<vmem>>, %arg3: memref<1x16x128xbf16, #tpu.memory_space<vmem>>, %arg4: memref<1x2x128xf32, #tpu.memory_space<vmem>>, %arg5: memref<1x18x64xbf16, #tpu.memory_space<vmem>>) attributes {dimension_semantics = [#tpu.dimension_semantics<parallel>], iteration_bounds = array<i64: 2>, scalar_prefetch = 0 : i64, scratch_operands = 1 : i64, tpu.core_type = #tpu.core_type<tc>, window_params = [{transform_indices = @transform_0, window_bounds = array<i64: 1, 16, 64>}, {pipeline_mode = #tpu.pipeline_mode<synchronous>, transform_indices = @transform_1, window_bounds = array<i64: 3, 64, 128>}, {transform_indices = @transform_2, window_bounds = array<i64: 1, 16, 128>}, {transform_indices = @transform_3, window_bounds = array<i64: 1, 2, 128>}]} {
    %c0 = arith.constant 0 : index
    %c0_0 = arith.constant 0 : index
    %c0_1 = arith.constant 0 : index
    %0 = vector.load %arg1[%c0, %c0_0, %c0_1] : memref<1x16x64xf32, #tpu.memory_space<vmem>>, vector<1x16x64xf32>
    %1 = arith.truncf %0 : vector<1x16x64xf32> to vector<1x16x64xbf16>
    %cst = arith.constant 0.000000e+00 : bf16
    %2 = vector.broadcast %cst : bf16 to vector<1x1x64xbf16>
    %c0_2 = arith.constant 0 : index
    %c0_3 = arith.constant 0 : index
    %c0_4 = arith.constant 0 : index
    %3 = vector.load %arg5[%c0_2, %c0_3, %c0_4] : memref<1x18x64xbf16, #tpu.memory_space<vmem>>, vector<1x1x64xbf16>
    tpu.vector_store %arg5[%c0_2, %c0_3, %c0_4], %2 {strides = array<i32>} : memref<1x18x64xbf16, #tpu.memory_space<vmem>>, vector<1x1x64xbf16>,
    %c0_5 = arith.constant 0 : index
    %c17 = arith.constant 17 : index
    %c0_6 = arith.constant 0 : index
    %4 = vector.load %arg5[%c0_5, %c17, %c0_6] : memref<1x18x64xbf16, #tpu.memory_space<vmem>>, vector<1x1x64xbf16>
    tpu.vector_store %arg5[%c0_5, %c17, %c0_6], %2 {strides = array<i32>} : memref<1x18x64xbf16, #tpu.memory_space<vmem>>, vector<1x1x64xbf16>,
    %c0_7 = arith.constant 0 : index
    %c1 = arith.constant 1 : index
    %c0_8 = arith.constant 0 : index
    %5 = vector.load %arg5[%c0_7, %c1, %c0_8] : memref<1x18x64xbf16, #tpu.memory_space<vmem>>, vector<1x16x64xbf16>
    tpu.vector_store %arg5[%c0_7, %c1, %c0_8], %1 {strides = array<i32>} : memref<1x18x64xbf16, #tpu.memory_space<vmem>>, vector<1x16x64xbf16>,
    %c0_9 = arith.constant 0 : index
    %c0_10 = arith.constant 0 : index
    %c0_11 = arith.constant 0 : index
    %6 = vector.load %arg5[%c0_9, %c0_10, %c0_11] : memref<1x18x64xbf16, #tpu.memory_space<vmem>>, vector<1x18x64xbf16>
    %7 = vector.shape_cast %6 : vector<1x18x64xbf16> to vector<18x64xbf16>
    %cst_12 = arith.constant 0.000000e+00 : f32
    %8 = vector.broadcast %cst_12 : f32 to vector<16x128xf32>
    %9 = vector.extract_strided_slice %7 {offsets = [0, 0], sizes = [16, 64], strides = [1, 1]} : vector<18x64xbf16> to vector<16x64xbf16>
    %c0_13 = arith.constant 0 : index
    %c0_14 = arith.constant 0 : index
    %c0_15 = arith.constant 0 : index
    %10 = vector.load %arg2[%c0_13, %c0_14, %c0_15] : memref<3x64x128xbf16, #tpu.memory_space<vmem>>, vector<1x64x128xbf16>
    %11 = vector.shape_cast %10 : vector<1x64x128xbf16> to vector<64x128xbf16>
    %cst_16 = arith.constant dense<0.000000e+00> : vector<16x128xf32>
    %12 = tpu.matmul %9, %11, %cst_16 {dimension_numbers = #tpu.dot_dimension_numbers<[1], [0], [0], [1], [0, 0, 1, 1], [], []>} : vector<16x64xbf16>, vector<64x128xbf16>, vector<16x128xf32> -> vector<16x128xf32>
    %13 = arith.addf %8, %12 : vector<16x128xf32>
    %14 = vector.extract_strided_slice %7 {offsets = [1, 0], sizes = [16, 64], strides = [1, 1]} : vector<18x64xbf16> to vector<16x64xbf16>
    %c1_17 = arith.constant 1 : index
    %c0_18 = arith.constant 0 : index
    %c0_19 = arith.constant 0 : index
    %15 = vector.load %arg2[%c1_17, %c0_18, %c0_19] : memref<3x64x128xbf16, #tpu.memory_space<vmem>>, vector<1x64x128xbf16>
    %16 = vector.shape_cast %15 : vector<1x64x128xbf16> to vector<64x128xbf16>
    %cst_20 = arith.constant dense<0.000000e+00> : vector<16x128xf32>
    %17 = tpu.matmul %14, %16, %cst_20 {dimension_numbers = #tpu.dot_dimension_numbers<[1], [0], [0], [1], [0, 0, 1, 1], [], []>} : vector<16x64xbf16>, vector<64x128xbf16>, vector<16x128xf32> -> vector<16x128xf32>
    %18 = arith.addf %13, %17 : vector<16x128xf32>
    %19 = vector.extract_strided_slice %7 {offsets = [2, 0], sizes = [16, 64], strides = [1, 1]} : vector<18x64xbf16> to vector<16x64xbf16>
    %c2 = arith.constant 2 : index
    %c0_21 = arith.constant 0 : index
    %c0_22 = arith.constant 0 : index
    %20 = vector.load %arg2[%c2, %c0_21, %c0_22] : memref<3x64x128xbf16, #tpu.memory_space<vmem>>, vector<1x64x128xbf16>
    %21 = vector.shape_cast %20 : vector<1x64x128xbf16> to vector<64x128xbf16>
    %cst_23 = arith.constant dense<0.000000e+00> : vector<16x128xf32>
    %22 = tpu.matmul %19, %21, %cst_23 {dimension_numbers = #tpu.dot_dimension_numbers<[1], [0], [0], [1], [0, 0, 1, 1], [], []>} : vector<16x64xbf16>, vector<64x128xbf16>, vector<16x128xf32> -> vector<16x128xf32>
    %23 = arith.addf %18, %22 : vector<16x128xf32>
    %cst_24 = arith.constant 0.000000e+00 : f32
    %24 = vector.broadcast %cst_24 : f32 to vector<1x128xf32>
    %cst_25 = arith.constant 0.000000e+00 : f32
    %25 = vector.broadcast %cst_25 : f32 to vector<1x128xf32>
    %26 = arith.truncf %23 : vector<16x128xf32> to vector<16x128xbf16>
    %c0_26 = arith.constant 0 : index
    %c0_27 = arith.constant 0 : index
    %c0_28 = arith.constant 0 : index
    %27 = vector.load %arg3[%c0_26, %c0_27, %c0_28] : memref<1x16x128xbf16, #tpu.memory_space<vmem>>, vector<1x16x128xbf16>
    %28 = vector.shape_cast %27 : vector<1x16x128xbf16> to vector<16x128xbf16>
    %29 = vector.shape_cast %26 : vector<16x128xbf16> to vector<1x16x128xbf16>
    tpu.vector_store %arg3[%c0_26, %c0_27, %c0_28], %29 {strides = array<i32>} : memref<1x16x128xbf16, #tpu.memory_space<vmem>>, vector<1x16x128xbf16>,
    %cst_29 = arith.constant dense<0.000000e+00> : vector<128xf32>
    %30 = vector.multi_reduction <add>, %23, %cst_29 [0] : vector<16x128xf32> to vector<128xf32>
    %31 = vector.shape_cast %30 : vector<128xf32> to vector<1x128xf32>
    %32 = arith.addf %24, %31 : vector<1x128xf32>
    %33 = arith.mulf %23, %23 : vector<16x128xf32>
    %cst_30 = arith.constant dense<0.000000e+00> : vector<128xf32>
    %34 = vector.multi_reduction <add>, %33, %cst_30 [0] : vector<16x128xf32> to vector<128xf32>
    %35 = vector.shape_cast %34 : vector<128xf32> to vector<1x128xf32>
    %36 = arith.addf %25, %35 : vector<1x128xf32>
    %c0_31 = arith.constant 0 : index
    %c0_32 = arith.constant 0 : index
    %c0_33 = arith.constant 0 : index
    %37 = vector.load %arg4[%c0_31, %c0_32, %c0_33] : memref<1x2x128xf32, #tpu.memory_space<vmem>>, vector<1x1x128xf32>
    %38 = vector.shape_cast %37 : vector<1x1x128xf32> to vector<1x128xf32>
    %39 = vector.shape_cast %32 : vector<1x128xf32> to vector<1x1x128xf32>
    tpu.vector_store %arg4[%c0_31, %c0_32, %c0_33], %39 {strides = array<i32>} : memref<1x2x128xf32, #tpu.memory_space<vmem>>, vector<1x1x128xf32>,
    %c0_34 = arith.constant 0 : index
    %c1_35 = arith.constant 1 : index
    %c0_36 = arith.constant 0 : index
    %40 = vector.load %arg4[%c0_34, %c1_35, %c0_36] : memref<1x2x128xf32, #tpu.memory_space<vmem>>, vector<1x1x128xf32>
    %41 = vector.shape_cast %40 : vector<1x1x128xf32> to vector<1x128xf32>
    %42 = vector.shape_cast %36 : vector<1x128xf32> to vector<1x1x128xf32>
    tpu.vector_store %arg4[%c0_34, %c1_35, %c0_36], %42 {strides = array<i32>} : memref<1x2x128xf32, #tpu.memory_space<vmem>>, vector<1x1x128xf32>,
    return
  }
  func.func @transform_0(%arg0: i32) -> (i32, i32, i32) {
    %c0_i32 = arith.constant 0 : i32
    %c0_i32_0 = arith.constant 0 : i32
    %c0_i32_1 = arith.constant 0 : i32
    return %arg0, %c0_i32, %c0_i32_0 : i32, i32, i32
  }
  func.func @transform_1(%arg0: i32) -> (i32, i32, i32) {
    %c0_i32 = arith.constant 0 : i32
    %c0_i32_0 = arith.constant 0 : i32
    %c0_i32_1 = arith.constant 0 : i32
    %c0_i32_2 = arith.constant 0 : i32
    return %c0_i32, %c0_i32_0, %c0_i32_1 : i32, i32, i32
  }
  func.func @transform_2(%arg0: i32) -> (i32, i32, i32) {
    %c0_i32 = arith.constant 0 : i32
    %c0_i32_0 = arith.constant 0 : i32
    %c0_i32_1 = arith.constant 0 : i32
    return %arg0, %c0_i32, %c0_i32_0 : i32, i32, i32
  }
  func.func @transform_3(%arg0: i32) -> (i32, i32, i32) {
    %c0_i32 = arith.constant 0 : i32
    %c0_i32_0 = arith.constant 0 : i32
    %c0_i32_1 = arith.constant 0 : i32
    return %arg0, %c0_i32, %c0_i32_0 : i32, i32, i32
  }
}

module attributes {stable_mosaic.version = 11 : i64} {
  func.func @_conv3x3_kernel(%arg0: i32, %arg1: memref<1x128xf32, #tpu.memory_space<vmem>>, %arg2: memref<1x128xf32, #tpu.memory_space<vmem>>, %arg3: memref<1x16x128xbf16, #tpu.memory_space<vmem>>, %arg4: memref<3x128x128xbf16, #tpu.memory_space<vmem>>, %arg5: memref<1x16x128xbf16, #tpu.memory_space<vmem>>, %arg6: memref<1x2x128xf32, #tpu.memory_space<vmem>>, %arg7: memref<1x18x128xbf16, #tpu.memory_space<vmem>>) attributes {dimension_semantics = [#tpu.dimension_semantics<parallel>], iteration_bounds = array<i64: 2>, scalar_prefetch = 0 : i64, scratch_operands = 1 : i64, tpu.core_type = #tpu.core_type<tc>, window_params = [{pipeline_mode = #tpu.pipeline_mode<synchronous>, transform_indices = @transform_0, window_bounds = array<i64: 1, 128>}, {pipeline_mode = #tpu.pipeline_mode<synchronous>, transform_indices = @transform_1, window_bounds = array<i64: 1, 128>}, {transform_indices = @transform_2, window_bounds = array<i64: 1, 16, 128>}, {pipeline_mode = #tpu.pipeline_mode<synchronous>, transform_indices = @transform_3, window_bounds = array<i64: 3, 128, 128>}, {transform_indices = @transform_4, window_bounds = array<i64: 1, 16, 128>}, {transform_indices = @transform_5, window_bounds = array<i64: 1, 2, 128>}]} {
    %c0 = arith.constant 0 : index
    %c0_0 = arith.constant 0 : index
    %c0_1 = arith.constant 0 : index
    %0 = vector.load %arg3[%c0, %c0_0, %c0_1] : memref<1x16x128xbf16, #tpu.memory_space<vmem>>, vector<1x16x128xbf16>
    %1 = arith.extf %0 : vector<1x16x128xbf16> to vector<1x16x128xf32>
    %c0_2 = arith.constant 0 : index
    %c0_3 = arith.constant 0 : index
    %2 = vector.load %arg1[%c0_2, %c0_3] : memref<1x128xf32, #tpu.memory_space<vmem>>, vector<1x128xf32>
    %3 = vector.shape_cast %2 : vector<1x128xf32> to vector<1x1x128xf32>
    %c0_4 = arith.constant 0 : index
    %c0_5 = arith.constant 0 : index
    %4 = vector.load %arg2[%c0_4, %c0_5] : memref<1x128xf32, #tpu.memory_space<vmem>>, vector<1x128xf32>
    %5 = vector.shape_cast %4 : vector<1x128xf32> to vector<1x1x128xf32>
    %6 = vector.broadcast %3 : vector<1x1x128xf32> to vector<1x16x128xf32>
    %7 = arith.mulf %1, %6 : vector<1x16x128xf32>
    %8 = vector.broadcast %5 : vector<1x1x128xf32> to vector<1x16x128xf32>
    %9 = arith.addf %7, %8 : vector<1x16x128xf32>
    %cst = arith.constant 0.000000e+00 : f32
    %10 = vector.broadcast %cst : f32 to vector<1x16x128xf32>
    %11 = arith.maximumf %9, %10 : vector<1x16x128xf32>
    %12 = arith.truncf %11 : vector<1x16x128xf32> to vector<1x16x128xbf16>
    %cst_6 = arith.constant 0.000000e+00 : bf16
    %13 = vector.broadcast %cst_6 : bf16 to vector<1x1x128xbf16>
    %c0_7 = arith.constant 0 : index
    %c0_8 = arith.constant 0 : index
    %c0_9 = arith.constant 0 : index
    %14 = vector.load %arg7[%c0_7, %c0_8, %c0_9] : memref<1x18x128xbf16, #tpu.memory_space<vmem>>, vector<1x1x128xbf16>
    tpu.vector_store %arg7[%c0_7, %c0_8, %c0_9], %13 {strides = array<i32>} : memref<1x18x128xbf16, #tpu.memory_space<vmem>>, vector<1x1x128xbf16>,
    %c0_10 = arith.constant 0 : index
    %c17 = arith.constant 17 : index
    %c0_11 = arith.constant 0 : index
    %15 = vector.load %arg7[%c0_10, %c17, %c0_11] : memref<1x18x128xbf16, #tpu.memory_space<vmem>>, vector<1x1x128xbf16>
    tpu.vector_store %arg7[%c0_10, %c17, %c0_11], %13 {strides = array<i32>} : memref<1x18x128xbf16, #tpu.memory_space<vmem>>, vector<1x1x128xbf16>,
    %c0_12 = arith.constant 0 : index
    %c1 = arith.constant 1 : index
    %c0_13 = arith.constant 0 : index
    %16 = vector.load %arg7[%c0_12, %c1, %c0_13] : memref<1x18x128xbf16, #tpu.memory_space<vmem>>, vector<1x16x128xbf16>
    tpu.vector_store %arg7[%c0_12, %c1, %c0_13], %12 {strides = array<i32>} : memref<1x18x128xbf16, #tpu.memory_space<vmem>>, vector<1x16x128xbf16>,
    %c0_14 = arith.constant 0 : index
    %c0_15 = arith.constant 0 : index
    %c0_16 = arith.constant 0 : index
    %17 = vector.load %arg7[%c0_14, %c0_15, %c0_16] : memref<1x18x128xbf16, #tpu.memory_space<vmem>>, vector<1x18x128xbf16>
    %18 = vector.shape_cast %17 : vector<1x18x128xbf16> to vector<18x128xbf16>
    %cst_17 = arith.constant 0.000000e+00 : f32
    %19 = vector.broadcast %cst_17 : f32 to vector<16x128xf32>
    %20 = vector.extract_strided_slice %18 {offsets = [0, 0], sizes = [16, 128], strides = [1, 1]} : vector<18x128xbf16> to vector<16x128xbf16>
    %c0_18 = arith.constant 0 : index
    %c0_19 = arith.constant 0 : index
    %c0_20 = arith.constant 0 : index
    %21 = vector.load %arg4[%c0_18, %c0_19, %c0_20] : memref<3x128x128xbf16, #tpu.memory_space<vmem>>, vector<1x128x128xbf16>
    %22 = vector.shape_cast %21 : vector<1x128x128xbf16> to vector<128x128xbf16>
    %cst_21 = arith.constant dense<0.000000e+00> : vector<16x128xf32>
    %23 = tpu.matmul %20, %22, %cst_21 {dimension_numbers = #tpu.dot_dimension_numbers<[1], [0], [0], [1], [0, 0, 1, 1], [], []>} : vector<16x128xbf16>, vector<128x128xbf16>, vector<16x128xf32> -> vector<16x128xf32>
    %24 = arith.addf %19, %23 : vector<16x128xf32>
    %25 = vector.extract_strided_slice %18 {offsets = [1, 0], sizes = [16, 128], strides = [1, 1]} : vector<18x128xbf16> to vector<16x128xbf16>
    %c1_22 = arith.constant 1 : index
    %c0_23 = arith.constant 0 : index
    %c0_24 = arith.constant 0 : index
    %26 = vector.load %arg4[%c1_22, %c0_23, %c0_24] : memref<3x128x128xbf16, #tpu.memory_space<vmem>>, vector<1x128x128xbf16>
    %27 = vector.shape_cast %26 : vector<1x128x128xbf16> to vector<128x128xbf16>
    %cst_25 = arith.constant dense<0.000000e+00> : vector<16x128xf32>
    %28 = tpu.matmul %25, %27, %cst_25 {dimension_numbers = #tpu.dot_dimension_numbers<[1], [0], [0], [1], [0, 0, 1, 1], [], []>} : vector<16x128xbf16>, vector<128x128xbf16>, vector<16x128xf32> -> vector<16x128xf32>
    %29 = arith.addf %24, %28 : vector<16x128xf32>
    %30 = vector.extract_strided_slice %18 {offsets = [2, 0], sizes = [16, 128], strides = [1, 1]} : vector<18x128xbf16> to vector<16x128xbf16>
    %c2 = arith.constant 2 : index
    %c0_26 = arith.constant 0 : index
    %c0_27 = arith.constant 0 : index
    %31 = vector.load %arg4[%c2, %c0_26, %c0_27] : memref<3x128x128xbf16, #tpu.memory_space<vmem>>, vector<1x128x128xbf16>
    %32 = vector.shape_cast %31 : vector<1x128x128xbf16> to vector<128x128xbf16>
    %cst_28 = arith.constant dense<0.000000e+00> : vector<16x128xf32>
    %33 = tpu.matmul %30, %32, %cst_28 {dimension_numbers = #tpu.dot_dimension_numbers<[1], [0], [0], [1], [0, 0, 1, 1], [], []>} : vector<16x128xbf16>, vector<128x128xbf16>, vector<16x128xf32> -> vector<16x128xf32>
    %34 = arith.addf %29, %33 : vector<16x128xf32>
    %cst_29 = arith.constant 0.000000e+00 : f32
    %35 = vector.broadcast %cst_29 : f32 to vector<1x128xf32>
    %cst_30 = arith.constant 0.000000e+00 : f32
    %36 = vector.broadcast %cst_30 : f32 to vector<1x128xf32>
    %37 = arith.truncf %34 : vector<16x128xf32> to vector<16x128xbf16>
    %c0_31 = arith.constant 0 : index
    %c0_32 = arith.constant 0 : index
    %c0_33 = arith.constant 0 : index
    %38 = vector.load %arg5[%c0_31, %c0_32, %c0_33] : memref<1x16x128xbf16, #tpu.memory_space<vmem>>, vector<1x16x128xbf16>
    %39 = vector.shape_cast %38 : vector<1x16x128xbf16> to vector<16x128xbf16>
    %40 = vector.shape_cast %37 : vector<16x128xbf16> to vector<1x16x128xbf16>
    tpu.vector_store %arg5[%c0_31, %c0_32, %c0_33], %40 {strides = array<i32>} : memref<1x16x128xbf16, #tpu.memory_space<vmem>>, vector<1x16x128xbf16>,
    %cst_34 = arith.constant dense<0.000000e+00> : vector<128xf32>
    %41 = vector.multi_reduction <add>, %34, %cst_34 [0] : vector<16x128xf32> to vector<128xf32>
    %42 = vector.shape_cast %41 : vector<128xf32> to vector<1x128xf32>
    %43 = arith.addf %35, %42 : vector<1x128xf32>
    %44 = arith.mulf %34, %34 : vector<16x128xf32>
    %cst_35 = arith.constant dense<0.000000e+00> : vector<128xf32>
    %45 = vector.multi_reduction <add>, %44, %cst_35 [0] : vector<16x128xf32> to vector<128xf32>
    %46 = vector.shape_cast %45 : vector<128xf32> to vector<1x128xf32>
    %47 = arith.addf %36, %46 : vector<1x128xf32>
    %c0_36 = arith.constant 0 : index
    %c0_37 = arith.constant 0 : index
    %c0_38 = arith.constant 0 : index
    %48 = vector.load %arg6[%c0_36, %c0_37, %c0_38] : memref<1x2x128xf32, #tpu.memory_space<vmem>>, vector<1x1x128xf32>
    %49 = vector.shape_cast %48 : vector<1x1x128xf32> to vector<1x128xf32>
    %50 = vector.shape_cast %43 : vector<1x128xf32> to vector<1x1x128xf32>
    tpu.vector_store %arg6[%c0_36, %c0_37, %c0_38], %50 {strides = array<i32>} : memref<1x2x128xf32, #tpu.memory_space<vmem>>, vector<1x1x128xf32>,
    %c0_39 = arith.constant 0 : index
    %c1_40 = arith.constant 1 : index
    %c0_41 = arith.constant 0 : index
    %51 = vector.load %arg6[%c0_39, %c1_40, %c0_41] : memref<1x2x128xf32, #tpu.memory_space<vmem>>, vector<1x1x128xf32>
    %52 = vector.shape_cast %51 : vector<1x1x128xf32> to vector<1x128xf32>
    %53 = vector.shape_cast %47 : vector<1x128xf32> to vector<1x1x128xf32>
    tpu.vector_store %arg6[%c0_39, %c1_40, %c0_41], %53 {strides = array<i32>} : memref<1x2x128xf32, #tpu.memory_space<vmem>>, vector<1x1x128xf32>,
    return
  }
  func.func @transform_0(%arg0: i32) -> (i32, i32) {
    %c0_i32 = arith.constant 0 : i32
    %c0_i32_0 = arith.constant 0 : i32
    %c0_i32_1 = arith.constant 0 : i32
    return %c0_i32, %c0_i32_0 : i32, i32
  }
  func.func @transform_1(%arg0: i32) -> (i32, i32) {
    %c0_i32 = arith.constant 0 : i32
    %c0_i32_0 = arith.constant 0 : i32
    %c0_i32_1 = arith.constant 0 : i32
    return %c0_i32, %c0_i32_0 : i32, i32
  }
  func.func @transform_2(%arg0: i32) -> (i32, i32, i32) {
    %c0_i32 = arith.constant 0 : i32
    %c0_i32_0 = arith.constant 0 : i32
    %c0_i32_1 = arith.constant 0 : i32
    return %arg0, %c0_i32, %c0_i32_0 : i32, i32, i32
  }
  func.func @transform_3(%arg0: i32) -> (i32, i32, i32) {
    %c0_i32 = arith.constant 0 : i32
    %c0_i32_0 = arith.constant 0 : i32
    %c0_i32_1 = arith.constant 0 : i32
    %c0_i32_2 = arith.constant 0 : i32
    return %c0_i32, %c0_i32_0, %c0_i32_1 : i32, i32, i32
  }
  func.func @transform_4(%arg0: i32) -> (i32, i32, i32) {
    %c0_i32 = arith.constant 0 : i32
    %c0_i32_0 = arith.constant 0 : i32
    %c0_i32_1 = arith.constant 0 : i32
    return %arg0, %c0_i32, %c0_i32_0 : i32, i32, i32
  }
  func.func @transform_5(%arg0: i32) -> (i32, i32, i32) {
    %c0_i32 = arith.constant 0 : i32
    %c0_i32_0 = arith.constant 0 : i32
    %c0_i32_1 = arith.constant 0 : i32
    return %arg0, %c0_i32, %c0_i32_0 : i32, i32, i32
  }
}

</mosaic_0001>

<bundles_post_ra>
// kernel: double_conv.2
= control target key start
LH: loop header
LB: loop body
LE: loop exit
PB: predicated region body
PF: predicated region fallthrough
CT: control target
= control target key end

     0   :  { %s658_s12 = smov 0   ;;  %s738_s0 = inlined_call_operand.vmem [shape: f32[2,16,64], index: 0, kind: input, shape index: {}]   ;;  %s739_s1 = inlined_call_operand.vmem [shape: bf16[3,64,128], index: 1, kind: input, shape index: {}]   ;;  %s740_s2 = inlined_call_operand.vmem [shape: bf16[2,16,128], index: 2, kind: output, shape index: {0}]   ;;  %s741_s3 = inlined_call_operand.vmem [shape: f32[2,2,128], index: 3, kind: output, shape index: {1}]  }
   0x1 LB: > { %s519_s13 = sadd.s32 4294967295, %s636_s12   ;;  %p523_p0 = scmp.ge.s32.totalorder %s636_s12, 1  ;;  %s636_s12 = sphi %s658_s12, %s14_s12  }
   0x2   : > { %p140_p1 = scmp.lt.s32.totalorder %s636_s12, 3 }
   0x4   : > { %p141_p2 = pnand %p523_p0, %p140_p1 }
   0x5   : > { %p168_p3 = scmp.lt.s32.totalorder (!%p141_p2), %s519_s13, 1 }
   0x6   : > { %144 = sbr.rel (%p141_p2) target bundleno = 202 (0xca), region = 28 }
   0xb   : > { %v608_v0 = vld [vmem:[%s739_s1 + $0x18] sm:$0xff]  ;;  %vm187_vm0 = vcmask 516096   ;;  %vm188_vm1 = vsmask.f32 256  ;;  %v607_v3 = vld [vmem:[%s739_s1 + $0x10] sm:$0xff]  ;;  %s745_s13 = smov (!%p168_p3, %s519_s13), 1 }
   0xc   : > { %v616_v1 = vld [vmem:[%s739_s1 + $0x58] sm:$0xff]  ;;  %343 = vmatpush.bf16.msra.mxu1 %v608_v0  ;;  %v615_v4 = vld [vmem:[%s739_s1 + $0x50] sm:$0xff]  ;;  %vm193_vm2 = vsmask.f32 7938  ;;  %vm688_vm3 = vmand %vm187_vm0, %vm188_vm1  ;;  %s602_s26 = sshll.u32 %s745_s13, 4  ;;  %vm220_vm6 = vcmask 519168  }
   0xd   : > { %v612_v2 = vld [vmem:[%s739_s1 + $0x38] sm:$0xff]  ;;  %397 = vmatpush.bf16.msra.mxu2 %v616_v1  ;;  %v611_v5 = vld [vmem:[%s739_s1 + $0x30] sm:$0xff]  ;;  %v190_v7 = vld [vmem:[#allocation2] sm:$0x1]  ;;  %s172_s4 = scalar_lea.vmem %s738_s0, %s602_s26  ;;  %vm198_vm5 = vsmask.f32 4368 }
   0xe   : > { %303 = vmatpush.bf16.msra.mxu0 %v612_v2  ;;  %v191_v8 = vsel %vm688_vm3, 0, %v190_v7  ;;  %vm194_vm4 = vmand %vm187_vm0, %vm193_vm2  ;;  %v606_v9 = vld [vmem:[%s739_s1 + $0x8] sm:$0xff]  ;;  %v183_v12 = vld [vmem:[%s172_s4] sm:$0xff]  ;;  %vm295_vm9 = vcmask 523264   ;;  %vm362_vm10 = vcmask 1046528   ;;  %s603_s17 = sshll.u32 %s745_s13, 3 }
   0xf   : > { %192 = vst [vmem:[#allocation2] sm:$0x1] %v191_v8  ;;  %v195_v10 = vld [vmem:[#allocation2 + $0x8] sm:$0x1]  ;;  %v185_v16 = vpack.c.bf16 %v183_v12, %v183_v12  ;;  %v605_v22 = vld [vmem:[%s739_s1] sm:$0xff]  ;;  %vm199_vm7 = vmor %vm188_vm1, %vm198_vm5  ;;  %s177_s20 = scalar_lea.vmem %s740_s2, %s603_s17  ;;  %s528_s21 = sshll.u32 %s745_s13, 1 }
  0x10   : > { %344 = vmatpush.bf16.msra.mxu1 %v607_v3  ;;  %v614_v11 = vld [vmem:[%s739_s1 + $0x48] sm:$0xff]  ;;  %v196_v14 = vsel %vm194_vm4, 0, %v195_v10  ;;  %v613_v23 = vld [vmem:[%s739_s1 + $0x40] sm:$0xff]  ;;  %vm221_vm8 = vmand %vm220_vm6, %vm193_vm2  ;;  %vm258_vm11 = vsmask.f32 7424  ;;  %s181_s24 = scalar_lea.vmem %s741_s3, %s528_s21 }
  0x11   : > { %398 = vmatpush.bf16.msra.mxu2 %v615_v4  ;;  %v184_v13 = vld [vmem:[%s172_s4 + $0x8] sm:$0xff]  ;;  %197 = vst [vmem:[#allocation2 + $0x8] sm:$0x1] %v196_v14  ;;  %v201_v18 = vshrl.u32 %v185_v16, 16  ;;  %v204_v19 = vshll.u32 %v185_v16, 16  ;;  %v609_v26 = vld [vmem:[%s739_s1 + $0x20] sm:$0xff] }
  0x12   : > { %304 = vmatpush.bf16.msra.mxu0 %v611_v5  ;;  %v610_v15 = vld [vmem:[%s739_s1 + $0x28] sm:$0xff]  ;;  %v186_v17 = vpack.c.bf16 %v184_v13, %v184_v13 }
  0x13   : > { %v203_v24 = vrot.slane %v201_v18, 7 }
  0x14   : > { %v209_v20 = vshrl.u32 %v186_v17, 16  ;;  %v212_v21 = vshll.u32 %v186_v17, 16  ;;  %345 = vmatpush.bf16.msra.mxu1 %v606_v9 }
  0x15   : > { %399 = vmatpush.bf16.msra.mxu2 %v614_v11  ;;  %v206_v28 = vor.u32 %v204_v19, %v203_v24  ;;  %v207_v29 = vrot.slane %v203_v24, 4 }
  0x16   : > { %305 = vmatpush.bf16.msra.mxu0 %v610_v15  ;;  %v211_v25 = vrot.slane %v209_v20, 7  ;;  %v222_v27 = vld [vmem:[#allocation2] sm:$0xf] }
  0x17   : > { %v223_v34 = vsel %vm221_vm8, %v206_v28, %v222_v27 }
  0x18   : > { %v214_v30 = vor.u32 %v212_v21, %v211_v25  ;;  %v216_v31 = vrot.slane %v211_v25, 4  ;;  %346 = vmatpush.bf16.msra.mxu1 %v605_v22  ;;  %v227_v32 = vld [vmem:[#allocation2 + $0x8] sm:$0x1]  ;;  %224 = vst [vmem:[#allocation2] sm:$0xf] %v223_v34 }
  0x19   : > { %400 = vmatpush.bf16.msra.mxu2 %v613_v23 }
  0x1a   : > { %v215_v33 = vsel %vm199_vm7, %v207_v29, %v214_v30  ;;  %306 = vmatpush.bf16.msra.mxu0 %v609_v26  ;;  %v228_v35 = vsel %vm688_vm3, %v216_v31, %v227_v32 }
  0x1b   : > { %226 = vst.msk [vmem:[#allocation2 + $0x4] sm:$0xf] %vm220_vm6, %v215_v33 }
  0x1c   : > { %229 = vst [vmem:[#allocation2 + $0x8] sm:$0x1] %v228_v35 }
  0x22   : > { %v604_v36 = vld [vmem:[#allocation2] sm:$0xff] }
  0x23   : > { %v232_v37 = vld [vmem:[#allocation2 + $0x8] sm:$0x1]  ;;  %574 = vmatmul.msk.bf16.vlgmr.msra.gmra.mxu1 %vm295_vm9, %v604_v36  ;;  %v260_v39 = vshrl.u32 %v604_v36, 16  ;;  %v262_v40 = vshll.u32 %v604_v36, 16  ;;  %v363_v42 = vrot.slane %v604_v36, 1 }
  0x24   : > { %v255_v38 = vunpack.c.l.b16 %v232_v37 }
  0x25   : > { %v264_v43 = vrot.slane %v262_v40, 1 }
  0x26   : > { %v257_v41 = vpack.c.b16 %v255_v38, %v255_v38 }
  0x27   : > { %v265_v45 = vor.u32 %v264_v43, %v260_v39 }
  0x28   : > { %v364_v44 = vrot.slane %v257_v41, 1  ;;  %v267_v46 = vshll.u32 %v257_v41, 16 }
  0x2a   : > { %v365_v47 = vsel %vm362_vm10, %v363_v42, %v364_v44  ;;  %v269_v48 = vrot.slane %v267_v46, 1 }
  0x2b   : > { %599 = vmatmul.msk.bf16.vlgmr.msra.gmra.mxu2 %vm295_vm9, %v365_v47 }
  0x2c   : > { %v270_v49 = vsel %vm258_vm11, %v265_v45, %v269_v48 }
  0x2d   : > { %557 = vmatmul.msk.bf16.vlgmr.msra.gmra.mxu0 %vm295_vm9, %v270_v49 }
  0xa0   : > { %v348_v50 = vpop.f32.mrf.mxu1 }
  0xa8   : > { %v350_v55 = vpop.f32.mrf.mxu1 }
  0xaa   : > { %v308_v51 = vpop.f32.mrf.mxu0 }
  0xab   : > { %v349_v53 = vadd.f32 %v348_v50, %v308_v51 }
  0xae   : > { %v402_v52 = vpop.f32.mrf.mxu2 }
  0xaf   : > { %v407_v56 = vadd.f32 %v402_v52, %v349_v53 }
  0xb1   : > { %v421_v60 = vmul.f32 %v407_v56, %v407_v56 }
  0xb2   : > { %v310_v54 = vpop.f32.mrf.mxu0 }
  0xb3   : > { %v351_v57 = vadd.f32 %v350_v55, %v310_v54 }
  0xb6   : > { %v404_v58 = vpop.f32.mrf.mxu2 }
  0xb7   : > { %v408_v59 = vadd.f32 %v404_v58, %v351_v57 }
  0xb9   : > { %v620_v61 = vpack.c.bf16 %v408_v59, %v407_v56  ;;  %v413_v62 = vadd.f32 %v408_v59, %v407_v56  ;;  %v422_v63 = vmul.f32 %v408_v59, %v408_v59 }
  0xbb   : > { %621 = vst [vmem:[%s177_s20] sm:$0xff] %v620_v61   ;;  %v414_v0 = vrot.slane %v413_v62, 4  ;;  %v423_v1 = vadd.f32 %v422_v63, %v421_v60 }
  0xbd   : > { %v415_v2 = vadd.f32 %v414_v0, %v413_v62  ;;  %v424_v3 = vrot.slane %v423_v1, 4 }
  0xbf   : > { %v416_v4 = vrot.slane %v415_v2, 2  ;;  %v425_v5 = vadd.f32 %v424_v3, %v423_v1 }
  0xc1   : > { %v417_v6 = vadd.f32 %v416_v4, %v415_v2  ;;  %v426_v7 = vrot.slane %v425_v5, 2 }
  0xc3   : > { %v418_v8 = vrot.slane %v417_v6, 1  ;;  %v427_v9 = vadd.f32 %v426_v7, %v425_v5 }
  0xc5   : > { %v419_v10 = vadd.f32 %v418_v8, %v417_v6  ;;  %v428_v11 = vrot.slane %v427_v9, 1 }
  0xc7   : > { %v429_v12 = vadd.f32 %v428_v11, %v427_v9  ;;  %431 = vst [vmem:[%s181_s24] sm:$0x1] %v419_v10 }
  0xc9   : > { %432 = vst [vmem:[%s181_s24 + $0x1] sm:$0x1] %v429_v12 }
  0xca PF: > { %s14_s12 = sadd.s32 1, %s636_s12  }
  0xcb   : > { %p11_p4 = scmp.ge.s32.totalorder %s14_s12, 4  }
  0xcd   :  { %13 = sbr.rel (!%p11_p4) target bundleno = 1 (0x1), region = 72 }

// kernel: tile.23
= control target key start
LH: loop header
LB: loop body
LE: loop exit
PB: predicated region body
PF: predicated region fallthrough
CT: control target
= control target key end

     0   :  { %s28_s0 = inlined_call_operand.vmem [shape: f32[8], index: 0, kind: input, shape index: {}]   ;;  %s29_s1 = inlined_call_operand.vmem [shape: f32[16,8], index: 1, kind: output, shape index: {}]  }
   0x1   :  { %v4_v0 = vld [vmem:[%s28_s0] ss:$0 sm:$0xff] }
   0x2   :  { %5 = vst [vmem:[%s29_s1] sm:$0xff] %v4_v0 }
   0x3   :  { %8 = vst [vmem:[%s29_s1 + $0x8] sm:$0xff] %v4_v0 }

// kernel: tile.24
= control target key start
LH: loop header
LB: loop body
LE: loop exit
PB: predicated region body
PF: predicated region fallthrough
CT: control target
= control target key end

     0   :  { %s131_s10 = smov 120   ;;  %s132_s11 = smov 104   ;;  %vm3_vm0 = vcmask 64512   ;;  %vm9_vm1 = vcmask 1048512   ;;  %vm15_vm2 = vcmask 982912   ;;  %vm21_vm3 = vcmask 917312   ;;  %s207_s0 = inlined_call_operand.vmem [shape: f32[16,8], index: 0, kind: input, shape index: {}]   ;;  %s208_s1 = inlined_call_operand.vmem [shape: f32[1,128], index: 1, kind: output, shape index: {}]  }
   0x1   :  { %v101_v0 = vld [vmem:[%s207_s0 + $0xf] sm:$0x1]   ;;  %v103_v1 = vld [vmem:[%s207_s0 + $0xd] sm:$0x1]   ;;  %v105_v2 = vld [vmem:[%s207_s0 + $0xb] sm:$0x1]  }
   0x2   :  { %7 = vrot.lane.b32.xlu0 %v101_v0, %s131_s10  ;;  %19 = vrot.lane.b32.xlu1 %v103_v1, %s132_s11  ;;  %s133_s14 = smov 88   ;;  %v102_v3 = vld [vmem:[%s207_s0 + $0xe] sm:$0x1]   ;;  %v104_v4 = vld [vmem:[%s207_s0 + $0xc] sm:$0x1]   ;;  %s134_s19 = smov 112  }
   0x3   :  { %31 = vrot.lane.b32.xlu2 %v105_v2, %s133_s14  ;;  %s135_s20 = smov 96   ;;  %v106_v5 = vld [vmem:[%s207_s0 + $0xa] sm:$0x1]   ;;  %s136_s23 = smov 80   ;;  %v107_v6 = vld [vmem:[%s207_s0 + $0x9] sm:$0x1]  }
   0x4   :  { %v108_v7 = vld [vmem:[%s207_s0 + $0x8] sm:$0x1]   ;;  %s137_s28 = smov 72   ;;  %s138_s29 = smov 64   ;;  %v109_v8 = vld [vmem:[%s207_s0 + $0x7] sm:$0x1]  }
   0x5   :  { %s139_s3 = smov 56   ;;  %v110_v9 = vld [vmem:[%s207_s0 + $0x6] sm:$0x1]   ;;  %v111_v10 = vld [vmem:[%s207_s0 + $0x5] sm:$0x1]   ;;  %s140_s8 = smov 48  }
   0x6   :  { %s141_s9 = smov 40   ;;  %v112_v11 = vld [vmem:[%s207_s0 + $0x4] sm:$0x1]   ;;  %s142_s12 = smov 32   ;;  %v113_v12 = vld [vmem:[%s207_s0 + $0x3] sm:$0x1]  }
   0x7   :  { %v114_v13 = vld [vmem:[%s207_s0 + $0x2] sm:$0x1]   ;;  %s143_s17 = smov 24   ;;  %s144_s18 = smov 16   ;;  %v115_v14 = vld [vmem:[%s207_s0 + $0x1] sm:$0x1]  }
   0x8   :  { %s145_s21 = smov 8   ;;  %v2_v15 = vld [vmem:[%s207_s0] sm:$0x1]   ;;  %vm27_vm4 = vcmask 851712   ;;  %vm33_vm5 = vcmask 786112   ;;  %vm39_vm6 = vcmask 720512  }
   0x9   :  { %4 = vst.msk [vmem:[#allocation0] sm:$0x1] %vm3_vm0, %v2_v15   ;;  %vm45_vm7 = vcmask 654912   ;;  %vm51_vm8 = vcmask 589312   ;;  %vm57_vm9 = vcmask 523712   ;;  %vm63_vm10 = vcmask 458112  }
   0xa   :  { %13 = vrot.lane.b32.xlu0 %v102_v3, %s134_s19  ;;  %25 = vrot.lane.b32.xlu1 %v104_v4, %s135_s20  ;;  %vm69_vm11 = vcmask 392512   ;;  %vm75_vm12 = vcmask 326912   ;;  %vm81_vm13 = vcmask 261312   ;;  %vm87_vm14 = vcmask 195712  }
   0xb   :  { %37 = vrot.lane.b32.xlu2 %v106_v5, %s136_s23  ;;  %vm93_vm15 = vcmask 130112  }
  0x12   :  { %43 = vrot.lane.b32.xlu0 %v107_v6, %s137_s28  ;;  %49 = vrot.lane.b32.xlu1 %v108_v7, %s138_s29 }
  0x13   :  { %55 = vrot.lane.b32.xlu2 %v109_v8, %s139_s3 }
  0x1a   :  { %61 = vrot.lane.b32.xlu0 %v110_v9, %s140_s8  ;;  %67 = vrot.lane.b32.xlu1 %v111_v10, %s141_s9 }
  0x1b   :  { %73 = vrot.lane.b32.xlu2 %v112_v11, %s142_s12 }
  0x22   :  { %79 = vrot.lane.b32.xlu0 %v113_v12, %s143_s17  ;;  %85 = vrot.lane.b32.xlu1 %v114_v13, %s144_s18 }
  0x23   :  { %91 = vrot.lane.b32.xlu2 %v115_v14, %s145_s21 }
  0x5d   :  { %v32_v16 = vpop.permute.xlu2 %31  }
  0x65   :  { %v38_v17 = vpop.permute.xlu2 %37  }
  0x6d   :  { %v56_v18 = vpop.permute.xlu2 %55  }
  0x74   :  { %v8_v19 = vpop.permute.xlu0 %7   ;;  %v20_v20 = vpop.permute.xlu1 %19  }
  0x75   :  { %10 = vst.msk [vmem:[#allocation0] sm:$0x1] %vm9_vm1, %v8_v19   ;;  %v74_v21 = vpop.permute.xlu2 %73  }
  0x7c   :  { %v14_v22 = vpop.permute.xlu0 %13   ;;  %v26_v23 = vpop.permute.xlu1 %25  }
  0x7d   :  { %16 = vst.msk [vmem:[#allocation0] sm:$0x1] %vm15_vm2, %v14_v22   ;;  %v92_v24 = vpop.permute.xlu2 %91  }
  0x7e   :  { %22 = vst.msk [vmem:[#allocation0] sm:$0x1] %vm21_vm3, %v20_v20  }
  0x7f   :  { %28 = vst.msk [vmem:[#allocation0] sm:$0x1] %vm27_vm4, %v26_v23  }
  0x80   :  { %34 = vst.msk [vmem:[#allocation0] sm:$0x1] %vm33_vm5, %v32_v16  }
  0x81   :  { %40 = vst.msk [vmem:[#allocation0] sm:$0x1] %vm39_vm6, %v38_v17  }
  0x84   :  { %v44_v25 = vpop.permute.xlu0 %43   ;;  %v50_v26 = vpop.permute.xlu1 %49  }
  0x85   :  { %46 = vst.msk [vmem:[#allocation0] sm:$0x1] %vm45_vm7, %v44_v25  }
  0x86   :  { %52 = vst.msk [vmem:[#allocation0] sm:$0x1] %vm51_vm8, %v50_v26  }
  0x87   :  { %58 = vst.msk [vmem:[#allocation0] sm:$0x1] %vm57_vm9, %v56_v18  }
  0x8c   :  { %v62_v27 = vpop.permute.xlu0 %61   ;;  %v68_v28 = vpop.permute.xlu1 %67  }
  0x8d   :  { %64 = vst.msk [vmem:[#allocation0] sm:$0x1] %vm63_vm10, %v62_v27  }
  0x8e   :  { %70 = vst.msk [vmem:[#allocation0] sm:$0x1] %vm69_vm11, %v68_v28  }
  0x8f   :  { %76 = vst.msk [vmem:[#allocation0] sm:$0x1] %vm75_vm12, %v74_v21  }
  0x94   :  { %v80_v29 = vpop.permute.xlu0 %79   ;;  %v86_v30 = vpop.permute.xlu1 %85  }
  0x95   :  { %82 = vst.msk [vmem:[#allocation0] sm:$0x1] %vm81_vm13, %v80_v29  }
  0x96   :  { %88 = vst.msk [vmem:[#allocation0] sm:$0x1] %vm87_vm14, %v86_v30  }
  0x97   :  { %94 = vst.msk [vmem:[#allocation0] sm:$0x1] %vm93_vm15, %v92_v24  }
  0x9e   :  { %v97_v31 = vld [vmem:[#allocation0] sm:$0x1] }
  0x9f   :  { %100 = vst [vmem:[%s208_s1] sm:$0x1] %v97_v31 }

// kernel: double_conv.3
= control target key start
LH: loop header
LB: loop body
LE: loop exit
PB: predicated region body
PF: predicated region fallthrough
CT: control target
= control target key end

     0   :  { %s906_s18 = smov 0   ;;  %s1038_s0 = inlined_call_operand.vmem [shape: f32[1,128], index: 0, kind: input, shape index: {}]   ;;  %s1039_s1 = inlined_call_operand.vmem [shape: f32[1,128], index: 1, kind: input, shape index: {}]   ;;  %s1040_s2 = inlined_call_operand.vmem [shape: bf16[2,16,128], index: 2, kind: input, shape index: {}]   ;;  %s1041_s3 = inlined_call_operand.vmem [shape: bf16[3,128,128], index: 3, kind: input, shape index: {}]   ;;  %s1042_s4 = inlined_call_operand.vmem [shape: bf16[2,16,128], index: 4, kind: output, shape index: {0}]   ;;  %s1043_s5 = inlined_call_operand.vmem [shape: f32[2,2,128], index: 5, kind: output, shape index: {1}]  }
   0x1 LB: > { %s678_s19 = sadd.s32 4294967295, %s874_s18   ;;  %p682_p0 = scmp.ge.s32.totalorder %s874_s18, 1  ;;  %s874_s18 = sphi %s906_s18, %s16_s18  }
   0x2   : > { %p190_p1 = scmp.lt.s32.totalorder %s874_s18, 3 }
   0x4   : > { %p191_p2 = pnand %p682_p0, %p190_p1 }
   0x5   : > { %p222_p3 = scmp.lt.s32.totalorder (!%p191_p2), %s678_s19, 1 }
   0x6   : > { %194 = sbr.rel (%p191_p2) target bundleno = 208 (0xd0), region = 36 }
   0xb   : > { %v832_v0 = vld [vmem:[%s1041_s3 + $0x38] sm:$0xff]  ;;  %v831_v3 = vld [vmem:[%s1041_s3 + $0x30] sm:$0xff]  ;;  %s1051_s19 = smov (!%p222_p3, %s678_s19), 1  ;;  %v830_v6 = vld [vmem:[%s1041_s3 + $0x28] sm:$0xff]  ;;  %vm257_vm0 = vcmask 1040384   ;;  %vm290_vm6 = vcmask 1043456  }
   0xc   : > { %v848_v1 = vld [vmem:[%s1041_s3 + $0xb8] sm:$0xff]  ;;  %468 = vmatpush.bf16.msra.mxu1 %v832_v0  ;;  %v847_v4 = vld [vmem:[%s1041_s3 + $0xb0] sm:$0xff]  ;;  %s822_s7 = sshll.u32 %s1051_s19, 3  ;;  %v846_v7 = vld [vmem:[%s1041_s3 + $0xa8] sm:$0xff]  ;;  %vm258_vm1 = vsmask.f32 256 }
   0xd   : > { %v840_v2 = vld [vmem:[%s1041_s3 + $0x78] sm:$0xff]  ;;  %552 = vmatpush.bf16.msra.mxu2 %v848_v1  ;;  %v839_v5 = vld [vmem:[%s1041_s3 + $0x70] sm:$0xff]  ;;  %s226_s10 = scalar_lea.vmem %s1040_s2, %s822_s7  ;;  %v838_v8 = vld [vmem:[%s1041_s3 + $0x68] sm:$0xff]  ;;  %vm263_vm3 = vsmask.f32 7938  ;;  %vm499_vm9 = vcmask 1046528   ;;  %s231_s9 = scalar_lea.vmem %s1042_s4, %s822_s7 }
   0xe   : > { %405 = vmatpush.bf16.msra.mxu0 %v840_v2  ;;  %v850_v9 = vld [vmem:[%s226_s10] sm:$0xff]   ;;  %vm957_vm2 = vmand %vm257_vm0, %vm258_vm1  ;;  %v265_v21 = vld [vmem:[#allocation2 + $0x8] sm:$0x1]  ;;  %vm268_vm5 = vsmask.f32 4368  ;;  %s687_s10 = sshll.u32 %s1051_s19, 1 }
   0xf   : > { %v851_v10 = vunpack.c.l.bf16 %v850_v9  ;;  %v852_v11 = vunpack.c.h.bf16 %v850_v9  ;;  %v866_v12 = vld [vmem:[%s1038_s0] ss:$0 sm:$0xff]  ;;  %vm264_vm4 = vmand %vm257_vm0, %vm263_vm3  ;;  %v828_v26 = vld [vmem:[%s1041_s3 + $0x18] sm:$0xff]  ;;  %vm343_vm10 = vsmask.f32 7424  ;;  %s235_s7 = scalar_lea.vmem %s1043_s5, %s687_s10 }
  0x10   : > { %469 = vmatpush.bf16.msra.mxu1 %v831_v3  ;;  %v867_v13 = vld [vmem:[%s1039_s1] ss:$0 sm:$0xff]  ;;  %v266_v25 = vsel %vm264_vm4, 0, %v265_v21  ;;  %v844_v27 = vld [vmem:[%s1041_s3 + $0x98] sm:$0xff]  ;;  %v827_v33 = vld [vmem:[%s1041_s3 + $0x10] sm:$0xff] }
  0x11   : > { %553 = vmatpush.bf16.msra.mxu2 %v847_v4  ;;  %v260_v15 = vld [vmem:[#allocation2] sm:$0x1]  ;;  %v246_v18 = vmul.f32 %v866_v12, %v851_v10  ;;  %v247_v19 = vmul.f32 %v866_v12, %v852_v11  ;;  %267 = vst [vmem:[#allocation2 + $0x8] sm:$0x1] %v266_v25  ;;  %v836_v30 = vld [vmem:[%s1041_s3 + $0x58] sm:$0xff]  ;;  %v843_v34 = vld [vmem:[%s1041_s3 + $0x90] sm:$0xff] }
  0x12   : > { %406 = vmatpush.bf16.msra.mxu0 %v839_v5  ;;  %v829_v16 = vld [vmem:[%s1041_s3 + $0x20] sm:$0xff]  ;;  %v261_v20 = vsel %vm957_vm2, 0, %v260_v15  ;;  %v835_v39 = vld [vmem:[%s1041_s3 + $0x50] sm:$0xff]  ;;  %vm993_vm7 = vmor %vm258_vm1, %vm268_vm5 }
  0x13   : > { %v845_v17 = vld [vmem:[%s1041_s3 + $0xa0] sm:$0xff]  ;;  %262 = vst [vmem:[#allocation2] sm:$0x1] %v261_v20  ;;  %v251_v23 = vadd.f32 %v867_v13, %v246_v18  ;;  %v252_v24 = vadd.f32 %v867_v13, %v247_v19  ;;  %vm998_vm8 = vmand %vm290_vm6, %vm263_vm3  ;;  %v826_v46 = vld [vmem:[%s1041_s3 + $0x8] sm:$0xff] }
  0x14   : > { %470 = vmatpush.bf16.msra.mxu1 %v830_v6  ;;  %v837_v22 = vld [vmem:[%s1041_s3 + $0x60] sm:$0xff]  ;;  %v842_v47 = vld [vmem:[%s1041_s3 + $0x88] sm:$0xff] }
  0x15   : > { %554 = vmatpush.bf16.msra.mxu2 %v846_v7  ;;  %v253_v28 = vmax.f32 %v251_v23, 0.0  ;;  %v254_v29 = vmax.f32 %v252_v24, 0.0  ;;  %v834_v52 = vld [vmem:[%s1041_s3 + $0x48] sm:$0xff]  ;;  %v825_v56 = vld [vmem:[%s1041_s3] sm:$0xff] }
  0x16   : > { %407 = vmatpush.bf16.msra.mxu0 %v838_v8  ;;  %v841_v57 = vld [vmem:[%s1041_s3 + $0x80] sm:$0xff] }
  0x17   : > { %v255_v31 = vpack.c.bf16 %v253_v28, %v253_v28  ;;  %v256_v32 = vpack.c.bf16 %v254_v29, %v254_v29  ;;  %v833_v58 = vld [vmem:[%s1041_s3 + $0x40] sm:$0xff] }
  0x18   : > { %471 = vmatpush.bf16.msra.mxu1 %v829_v16  ;;  %v296_v45 = vld [vmem:[#allocation2 + $0x8] sm:$0x1] }
  0x19   : > { %555 = vmatpush.bf16.msra.mxu2 %v845_v17  ;;  %v271_v35 = vshrl.u32 %v255_v31, 16  ;;  %v274_v36 = vshll.u32 %v255_v31, 16  ;;  %v279_v37 = vshrl.u32 %v256_v32, 16  ;;  %v282_v38 = vshll.u32 %v256_v32, 16 }
  0x1a   : > { %408 = vmatpush.bf16.msra.mxu0 %v837_v22  ;;  %v292_v44 = vld [vmem:[#allocation2] sm:$0xf] }
  0x1b   : > { %v273_v41 = vrot.slane %v271_v35, 7  ;;  %v281_v42 = vrot.slane %v279_v37, 7 }
  0x1c   : > { %472 = vmatpush.bf16.msra.mxu1 %v828_v26 }
  0x1d   : > { %556 = vmatpush.bf16.msra.mxu2 %v844_v27  ;;  %v276_v48 = vor.u32 %v274_v36, %v273_v41  ;;  %v277_v49 = vrot.slane %v273_v41, 4  ;;  %v284_v50 = vor.u32 %v282_v38, %v281_v42  ;;  %v286_v51 = vrot.slane %v281_v42, 4 }
  0x1e   : > { %409 = vmatpush.bf16.msra.mxu0 %v836_v30 }
  0x1f   : > { %v285_v53 = vsel %vm993_vm7, %v277_v49, %v284_v50  ;;  %v293_v54 = vsel %vm998_vm8, %v276_v48, %v292_v44  ;;  %v297_v55 = vsel %vm957_vm2, %v286_v51, %v296_v45 }
  0x20   : > { %473 = vmatpush.bf16.msra.mxu1 %v827_v33  ;;  %294 = vst [vmem:[#allocation2] sm:$0xf] %v293_v54 }
  0x21   : > { %557 = vmatpush.bf16.msra.mxu2 %v843_v34  ;;  %295 = vst [vmem:[#allocation2 + $0x4] sm:$0xf] %v285_v53 }
  0x22   : > { %410 = vmatpush.bf16.msra.mxu0 %v835_v39  ;;  %298 = vst [vmem:[#allocation2 + $0x8] sm:$0x1] %v297_v55 }
  0x24   : > { %474 = vmatpush.bf16.msra.mxu1 %v826_v46 }
  0x25   : > { %558 = vmatpush.bf16.msra.mxu2 %v842_v47 }
  0x26   : > { %411 = vmatpush.bf16.msra.mxu0 %v834_v52 }
  0x28   : > { %475 = vmatpush.bf16.msra.mxu1 %v825_v56  ;;  %v824_v59 = vld [vmem:[#allocation2] sm:$0xff] }
  0x29   : > { %559 = vmatpush.bf16.msra.mxu2 %v841_v57  ;;  %v301_v60 = vld [vmem:[#allocation2 + $0x8] sm:$0x1]  ;;  %v345_v62 = vshrl.u32 %v824_v59, 16  ;;  %v347_v63 = vshll.u32 %v824_v59, 16  ;;  %v500_v1 = vrot.slane %v824_v59, 1 }
  0x2a   : > { %412 = vmatpush.bf16.msra.mxu0 %v833_v58  ;;  %v340_v61 = vunpack.c.l.b16 %v301_v60 }
  0x2b   : > { %476 = vmatmul.bf16.vlgmr.msra.gmra.mxu1 %v824_v59  ;;  %v349_v2 = vrot.slane %v347_v63, 1 }
  0x2c   : > { %v342_v0 = vpack.c.b16 %v340_v61, %v340_v61 }
  0x2d   : > { %v350_v4 = vor.u32 %v349_v2, %v345_v62 }
  0x2e   : > { %v501_v3 = vrot.slane %v342_v0, 1  ;;  %v352_v5 = vshll.u32 %v342_v0, 16 }
  0x30   : > { %v502_v6 = vsel %vm499_vm9, %v500_v1, %v501_v3  ;;  %v354_v7 = vrot.slane %v352_v5, 1 }
  0x31   : > { %560 = vmatmul.bf16.vlgmr.msra.gmra.mxu2 %v502_v6 }
  0x32   : > { %v355_v8 = vsel %vm343_vm10, %v350_v4, %v354_v7 }
  0x33   : > { %413 = vmatmul.bf16.vlgmr.msra.gmra.mxu0 %v355_v8 }
  0xa8   : > { %v477_v9 = vpop.f32.mrf.mxu1 }
  0xb0   : > { %v414_v10 = vpop.f32.mrf.mxu0  ;;  %v479_v14 = vpop.f32.mrf.mxu1 }
  0xb1   : > { %v478_v12 = vadd.f32 %v477_v9, %v414_v10 }
  0xb4   : > { %v561_v11 = vpop.f32.mrf.mxu2 }
  0xb5   : > { %v566_v15 = vadd.f32 %v561_v11, %v478_v12 }
  0xb7   : > { %v580_v19 = vmul.f32 %v566_v15, %v566_v15 }
  0xb8   : > { %v416_v13 = vpop.f32.mrf.mxu0 }
  0xb9   : > { %v480_v16 = vadd.f32 %v479_v14, %v416_v13 }
  0xbc   : > { %v563_v17 = vpop.f32.mrf.mxu2 }
  0xbd   : > { %v567_v18 = vadd.f32 %v563_v17, %v480_v16 }
  0xbf   : > { %v856_v20 = vpack.c.bf16 %v567_v18, %v566_v15  ;;  %v572_v21 = vadd.f32 %v567_v18, %v566_v15  ;;  %v581_v22 = vmul.f32 %v567_v18, %v567_v18 }
  0xc1   : > { %857 = vst [vmem:[%s231_s9] sm:$0xff] %v856_v20   ;;  %v573_v23 = vrot.slane %v572_v21, 4  ;;  %v582_v24 = vadd.f32 %v581_v22, %v580_v19 }
  0xc3   : > { %v574_v25 = vadd.f32 %v573_v23, %v572_v21  ;;  %v583_v26 = vrot.slane %v582_v24, 4 }
  0xc5   : > { %v575_v27 = vrot.slane %v574_v25, 2  ;;  %v584_v28 = vadd.f32 %v583_v26, %v582_v24 }
  0xc7   : > { %v576_v29 = vadd.f32 %v575_v27, %v574_v25  ;;  %v585_v30 = vrot.slane %v584_v28, 2 }
  0xc9   : > { %v577_v31 = vrot.slane %v576_v29, 1  ;;  %v586_v32 = vadd.f32 %v585_v30, %v584_v28 }
  0xcb   : > { %v578_v33 = vadd.f32 %v577_v31, %v576_v29  ;;  %v587_v34 = vrot.slane %v586_v32, 1 }
  0xcd   : > { %v588_v35 = vadd.f32 %v587_v34, %v586_v32  ;;  %590 = vst [vmem:[%s235_s7] sm:$0x1] %v578_v33 }
  0xcf   : > { %591 = vst [vmem:[%s235_s7 + $0x1] sm:$0x1] %v588_v35 }
  0xd0 PF: > { %s16_s18 = sadd.s32 1, %s874_s18  }
  0xd1   : > { %p13_p4 = scmp.ge.s32.totalorder %s16_s18, 4  }
  0xd3   :  { %15 = sbr.rel (!%p13_p4) target bundleno = 1 (0x1), region = 80 }

</bundles_post_ra>
